<compile_context>
chip_gen: v5e
topology: v5e:2x2
jax: 0.10.0
libtpu: 0.0.40
codegen_flags: <defaults>
</compile_context>

<pallas_src>
import jax
import jax.numpy as jnp
from jax.experimental import pallas as pl
from jax.experimental.pallas import tpu as pltpu


# ----------------------------------------------------------------------------
# Helpers
# ----------------------------------------------------------------------------
def _pick_block_rows(batch, feat, target_bytes=2 * 1024 * 1024):
    """Rows per tile so an f32 tile is ~<=2 MiB (VMEM-safe on v5e/v6e/v7x)."""
    rows = max(8, target_bytes // (feat * 4))
    rows = min(int(rows), batch)
    if rows < batch:
        # Multiple of 16: sublane-aligned (8) and cleanly halved for the
        # paired sin/cos Box-Muller below.
        rows = max(8, (rows // 16) * 16)
    return int(rows)


def _unit_float(shape):
    """Random float32 in [1, 2) via the mantissa bit-trick (no int->float
    convert): take 23 random mantissa bits, OR in the exponent of 1.0."""
    bits = pltpu.bitcast(pltpu.prng_random_bits(shape), jnp.uint32)
    return pltpu.bitcast((bits >> 9) | jnp.uint32(0x3F800000), jnp.float32)


# ----------------------------------------------------------------------------
# Kernels
# ----------------------------------------------------------------------------
def _make_tpu_kernel(sigma, tile_rows, feat):
    """In-kernel noise generation with the TPU hardware PRNG."""
    paired = (tile_rows % 16 == 0)  # can we split the tile in two halves?

    def kernel(seed_ref, x_ref, o_ref):
        # Distinct seed per grid step so every tile draws independent noise.
        pltpu.prng_seed(seed_ref[0], pl.program_id(0))

        if paired:
            half = tile_rows // 2
            f1 = _unit_float((half, feat))            # in [1, 2)
            f2 = _unit_float((half, feat))            # in [1, 2)
            u1 = 2.0 - f1                             # in (0, 1] -> log finite
            r = jnp.sqrt(-2.0 * jnp.log(u1))
            theta = (2.0 * jnp.pi) * f2               # offset by 2*pi is a no-op
            # Both Box-Muller branches: two normals per (u1, u2) pair.
            z = jnp.concatenate([r * jnp.cos(theta), r * jnp.sin(theta)], axis=0)
        else:
            f1 = _unit_float((tile_rows, feat))
            f2 = _unit_float((tile_rows, feat))
            r = jnp.sqrt(-2.0 * jnp.log(2.0 - f1))
            z = r * jnp.cos((2.0 * jnp.pi) * f2)

        noise = 1.0 + jnp.float32(sigma) * z          # Normal(mean=1, std=sigma)
        o_ref[...] = (x_ref[...].astype(jnp.float32) * noise).astype(o_ref.dtype)

    return kernel


def _make_mul_kernel(sigma):
    """Fallback kernel: noise z (standard normal) is sampled outside."""
    def kernel(x_ref, z_ref, o_ref):
        noise = 1.0 + jnp.float32(sigma) * z_ref[...]
        o_ref[...] = (x_ref[...].astype(jnp.float32) * noise).astype(o_ref.dtype)

    return kernel


# ----------------------------------------------------------------------------
# Public wrapper
# ----------------------------------------------------------------------------
def gaussian_noise_layer(x, seed, sigma, *, block_rows=None):
    """x: (B, F) float32/bf16; seed: python int; sigma: python float.

    Returns x * noise with noise ~ Normal(1, sigma), resampled per call.
    """
    B, F = x.shape
    tb = block_rows if block_rows is not None else _pick_block_rows(B, F)
    tb = min(int(tb), B)
    grid = (pl.cdiv(B, tb),)
    out_shape = jax.ShapeDtypeStruct((B, F), x.dtype)
    tile_map = lambda i: (i, 0)

    if jax.default_backend() == "tpu":
        seed_arr = jnp.asarray([seed], dtype=jnp.int32)
        return pl.pallas_call(
            _make_tpu_kernel(float(sigma), tb, F),
            out_shape=out_shape,
            grid=grid,
            in_specs=[
                pl.BlockSpec(memory_space=pltpu.SMEM),        # seed scalar
                pl.BlockSpec((tb, F), tile_map),              # x tile
            ],
            out_specs=pl.BlockSpec((tb, F), tile_map),        # lane-dense (full F)
            compiler_params=pltpu.CompilerParams(
                dimension_semantics=("parallel",),            # v7x: shard over 2 TCs
                has_side_effects=True,                        # stateful PRNG
            ),
        )(seed_arr, x)

    # Non-TPU / interpret backends: the TPU hardware PRNG has no lowering
    # there, so sample the standard-normal noise with jax.random and run the
    # same tiled elementwise multiply kernel.
    z = jax.random.normal(jax.random.PRNGKey(seed), (B, F), dtype=jnp.float32)
    return pl.pallas_call(
        _make_mul_kernel(float(sigma)),
        out_shape=out_shape,
        grid=grid,
        in_specs=[
            pl.BlockSpec((tb, F), tile_map),
            pl.BlockSpec((tb, F), tile_map),
        ],
        out_specs=pl.BlockSpec((tb, F), tile_map),
    )(x, z)


# ----------------------------------------------------------------------------
# Demo / self-test
# ----------------------------------------------------------------------------
if __name__ == "__main__":
    # Module uses HALF_BATCH_SIZE = 128 rows; pick a small feature dim.
    B, F = 128, 256
    sigma = 0.1

    key = jax.random.PRNGKey(0)
    x = jax.random.normal(key, (B, F), dtype=jnp.float32)

    # block_rows=64 -> grid=(2,) so the multi-tile / per-tile-seed path is
    # exercised even at this small demo size.
    out = gaussian_noise_layer(x, seed=42, sigma=sigma, block_rows=64)
    out = jax.block_until_ready(out)

    assert out.shape == (B, F)
    assert bool(jnp.all(jnp.isfinite(out)))

    # out - x = sigma * x * z : mean ~ 0, std ~ sigma (x, z std-normal, indep.)
    d = out - x
    assert abs(float(jnp.mean(d))) < 0.01
    s = float(jnp.std(d))
    assert 0.5 * sigma < s < 2.0 * sigma
    # Per-tile seeding: the two row-tiles must not share the same noise draw.
    assert not bool(jnp.allclose(d[:64], d[64:]))

    print("KERNEL_OK")
</pallas_src>

<mosaic_0001>
module attributes {stable_mosaic.version = 11 : i64} {
  func.func @kernel(%arg0: i32, %arg1: memref<64x256xf32, #tpu.memory_space<vmem>>, %arg2: memref<64x256xf32, #tpu.memory_space<vmem>>, %arg3: memref<64x256xf32, #tpu.memory_space<vmem>>) attributes {dimension_semantics = [#tpu.dimension_semantics<arbitrary>], iteration_bounds = array<i64: 2>, scalar_prefetch = 0 : i64, scratch_operands = 0 : i64, tpu.core_type = #tpu.core_type<tc>, window_params = [{transform_indices = @transform_0, window_bounds = array<i64: 64, 256>}, {transform_indices = @transform_1, window_bounds = array<i64: 64, 256>}, {transform_indices = @transform_2, window_bounds = array<i64: 64, 256>}]} {
    %c0 = arith.constant 0 : index
    %c0_0 = arith.constant 0 : index
    %0 = vector.load %arg2[%c0, %c0_0] : memref<64x256xf32, #tpu.memory_space<vmem>>, vector<64x256xf32>
    %cst = arith.constant 1.000000e-01 : f32
    %1 = vector.broadcast %cst : f32 to vector<64x256xf32>
    %2 = arith.mulf %1, %0 : vector<64x256xf32>
    %cst_1 = arith.constant 1.000000e+00 : f32
    %3 = vector.broadcast %cst_1 : f32 to vector<64x256xf32>
    %4 = arith.addf %3, %2 : vector<64x256xf32>
    %c0_2 = arith.constant 0 : index
    %c0_3 = arith.constant 0 : index
    %5 = vector.load %arg1[%c0_2, %c0_3] : memref<64x256xf32, #tpu.memory_space<vmem>>, vector<64x256xf32>
    %6 = arith.mulf %5, %4 : vector<64x256xf32>
    %c0_4 = arith.constant 0 : index
    %c0_5 = arith.constant 0 : index
    %7 = vector.load %arg3[%c0_4, %c0_5] : memref<64x256xf32, #tpu.memory_space<vmem>>, vector<64x256xf32>
    tpu.vector_store %arg3[%c0_4, %c0_5], %6 {strides = array<i32>} : memref<64x256xf32, #tpu.memory_space<vmem>>, vector<64x256xf32>,
    return
  }
  func.func @transform_0(%arg0: i32) -> (i32, i32) {
    %c0_i32 = arith.constant 0 : i32
    %c0_i32_0 = arith.constant 0 : i32
    return %arg0, %c0_i32 : i32, i32
  }
  func.func @transform_1(%arg0: i32) -> (i32, i32) {
    %c0_i32 = arith.constant 0 : i32
    %c0_i32_0 = arith.constant 0 : i32
    return %arg0, %c0_i32 : i32, i32
  }
  func.func @transform_2(%arg0: i32) -> (i32, i32) {
    %c0_i32 = arith.constant 0 : i32
    %c0_i32_0 = arith.constant 0 : i32
    return %arg0, %c0_i32 : i32, i32
  }
}

</mosaic_0001>

<bundles_post_ra>
// kernel: tpu_custom_call.1
= control target key start
LH: loop header
LB: loop body
LE: loop exit
PB: predicated region body
PF: predicated region fallthrough
CT: control target
= control target key end

     0   :  { %7 = vsyncpa [#allocation3], 0  ;;  %s883_s0 = inlined_call_operand.hbm [shape: f32[128,256], index: 0, kind: input, shape index: {}]   ;;  %s884_s1 = inlined_call_operand.hbm [shape: f32[128,256], index: 1, kind: input, shape index: {}]   ;;  %s885_s2 = inlined_call_operand.hbm [shape: f32[128,256], index: 2, kind: output, shape index: {}]  }
   0x1   :  { %9 = vsyncpa [#allocation3 + $0x1], 0 }
   0x2   :  { %10 = vsyncpa [#allocation6], 0 }
   0x3   :  { %12 = vsyncpa [#allocation6 + $0x1], 0 }
   0x4   :  { %13 = vsyncpa [#allocation4], 0 }
   0x5   :  { %15 = vsyncpa [#allocation4 + $0x1], 0  ;;  %s653_s9 = smov 0   ;;  %s655_s10 = smov 0  }
   0x6   :  { %s657_s11 = smov 0   ;;  %s659_s12 = smov 0  }
   0x7 LB: > { %s674_s13 = sadd.s32 4294967295, %s632_s12   ;;  %s420_s14 = sadd.s32 4294967294, %s632_s12   ;;  %s632_s12 = sphi %s659_s12, %s896_s12   ;;  %s628_s11 = sphi %s657_s11, %s895_s11   ;;  %s624_s10 = sphi %s655_s10, %s894_s10   ;;  %s620_s9 = sphi %s653_s9, %s893_s9  }
   0x8   : > { %s678_s15 = sadd.s32 1, %s632_s12   ;;  %s28_s16 = sadd.s32 1, %s628_s11 }
   0x9   : > { %s25_s17 = ssub.s32 %s632_s12, %s678_s15  ;;  %p35_p0 = scmp.ne.s32.totalorder %s628_s11, %s624_s10 }
   0xa   : > { %p26_p1 = scmp.eq.s32.totalorder %s25_s17, 0  ;;  %p36_p2 = scmp.eq.s32.totalorder %s632_s12, 0 }
   0xb   : > { %p41_p3 = scmp.ne.s32.totalorder %s624_s10, %s620_s9  ;;  %p42_p4 = scmp.eq.s32.totalorder %s674_s13, 0 }
   0xc   : > { %s690_s18 = scalar_select %p26_p1, %s628_s11, %s28_s16  }
   0xd   : > { %p692_p5 = por %p36_p2, %p35_p0  ;;  %p696_p6 = por %p42_p4, %p41_p3 }
   0xe   : > { %p91_p7 = scmp.eq.s32.totalorder %s674_s13, 1  ;;  %p97_p8 = scmp.eq.s32.totalorder %s420_s14, 1 }
   0xf   : > { %p464_p10 = scmp.lt.s32.totalorder %s632_s12, 2  ;;  %s712_s23 = sand.u32 1, %s628_s11  }
  0x10   : > { %p703_p11 = por %p91_p7, %p35_p0  ;;  %p707_p12 = por %p97_p8, %p41_p3 }
  0x11   : > { %s442_s24 = sshll.u32 %s632_s12, 7  ;;  %s423_s25 = sshll.u32 %s712_s23, 7 }
  0x12   : > { %s127_s28 = scalar_lea.hbm %s883_s0, %s442_s24  ;;  %s121_s30 = scalar_lea.vmem [#allocation2], %s423_s25 }
  0x13   : > { %s128_s29 = sshll.u32 %s127_s28, 4  ;;  %s130_s3 = sshll.u32 %s121_s30, 4  ;;  %s129_s29 = int_to_ptr.hbm [resolvable:$true] %s128_s29  ;;  %s131_s3 = int_to_ptr.vmem [resolvable:$true] %s130_s3 }
  0x14   : > { %p725_p13 = pnand %p464_p10, %p692_p5  ;;  %p431_p0 = scmp.ge.s32.totalorder %s632_s12, 1 }
  0x15   : > { %p161_p1 = scmp.lt.s32.totalorder %s632_s12, 3  ;;  %s118_s5 = scalar_lea.sflag [#allocation3], %s712_s23 }
  0x16   : > { %s502_s6 = sshra.s32 %s129_s29, 4  ;;  %p506_p3 = pneg %p725_p13  ;;  %s503_s6 = int_to_ptr.hbm [resolvable:$true] %s502_s6 }
  0x17   : > { %s504_s7 = scalar_lea.hbm %s503_s6, 128  ;;  %s509_s16 = scalar_lea.hbm %s883_s0, 256 }
  0x18   : > { %p505_p2 = scmp.ne.s32.totalorder %s503_s6, %s504_s7  ;;  %p510_p5 = scmp.lt.s32.totalorder %s503_s6, %s883_s0 }
  0x19   : > { %p511_p8 = scmp.lt.s32.totalorder %s509_s16, %s504_s7 }
  0x1a   : > { %p507_p4 = pnand %p506_p3, %p505_p2 }
  0x1b   : > { %p512_p10 = por %p511_p8, %p510_p5 }
  0x1c   : > { %p508_p7 = pneg %p507_p4 }
  0x1e   : > { %p513_p9 = pnand %p512_p10, %p508_p7 }
  0x20   : > { %516 = shalt.err (!%p513_p9)
}
  0x21   : > { %s634_s26 = smov 256   ;;  %s635_s27 = smov 16  }
  0x22   : > { %456 = dma.hbm_to_vmem [thread:$0]  (!%p725_p13), %s129_s29, 2048, %s131_s3, %s118_s5, %s634_s26, %s634_s26, %s635_s27  }
  0x23   : > { %p749_p2 = pnand %p431_p0, %p161_p1  ;;  %s150_s7 = scalar_lea.hbm %s884_s1, %s442_s24 }
  0x24   : > { %s151_s8 = sshll.u32 %s150_s7, 4  ;;  %s144_s14 = scalar_lea.vmem [#allocation5], %s423_s25  ;;  %s152_s8 = int_to_ptr.hbm [resolvable:$true] %s151_s8 }
  0x25   : > { %s153_s16 = sshll.u32 %s144_s14, 4  ;;  %s141_s17 = scalar_lea.sflag [#allocation6], %s712_s23  ;;  %s154_s16 = int_to_ptr.vmem [resolvable:$true] %s153_s16 }
  0x26   : > { %s532_s19 = sshra.s32 %s152_s8, 4  ;;  %s539_s30 = scalar_lea.hbm %s884_s1, 256  ;;  %s533_s19 = int_to_ptr.hbm [resolvable:$true] %s532_s19 }
  0x27   : > { %s534_s29 = scalar_lea.hbm %s533_s19, 128  ;;  %p540_p4 = scmp.lt.s32.totalorder %s533_s19, %s884_s1 }
  0x28   : > { %p535_p9 = scmp.ne.s32.totalorder %s533_s19, %s534_s29  ;;  %p541_p7 = scmp.lt.s32.totalorder %s539_s30, %s534_s29 }
  0x2a   : > { %p537_p0 = pnand %p535_p9, %p506_p3  ;;  %p542_p5 = por %p541_p7, %p540_p4 }
  0x2c   : > { %p538_p1 = pneg %p537_p0 }
  0x2e   : > { %p543_p8 = pnand %p542_p5, %p538_p1 }
  0x30   : > { %546 = shalt.err (!%p543_p8)
}
  0x31   : > { %459 = dma.hbm_to_vmem [thread:$0]  (!%p725_p13), %s152_s8, 2048, %s154_s16, %s141_s17, %s634_s26, %s634_s26, %s635_s27  }
  0x32   : > { %165 = sbr.rel (%p749_p2) target bundleno = 87 (0x57), region = 28  ;;  %s775_s23 = sand.u32 (!%p749_p2), 1, %s624_s10  }
  0x33   : > { %s778_s25 = sshll.u32 (!%p749_p2), %s775_s23, 7  ;;  %s168_s7 = scalar_lea.sflag (!%p749_p2), [#allocation3], %s775_s23 }
  0x34   : > { %s782_s14 = scalar_lea.vmem (!%p749_p2), [#allocation2], %s778_s25 }
  0x37   : > { %607 = dma.done.wait (%p696_p6), %s168_s7, 2048  }
  0x38   : > { %609 = vsyncadd (%p696_p6), %s168_s7, 4294965248  ;;  %s178_s4 = scalar_lea.sflag [#allocation6], %s775_s23  ;;  %s790_s26 = scalar_lea.vmem [#allocation5], %s778_s25 }
  0x39   : > { %611 = dma.done.wait (%p696_p6), %s178_s4, 2048  }
  0x3a   : > { %613 = vsyncadd (%p696_p6), %s178_s4, 4294965248  ;;  %v211_v0 = vld [vmem:[%s790_s26] sm:$0xff]  ;;  %v212_v1 = vld [vmem:[%s790_s26 + $0x8] sm:$0xff]  ;;  %s446_s20 = sshll.u32 %s674_s13, 7  ;;  %s814_s27 = scalar_lea.vmem [#allocation7], %s778_s25 }
  0x3b   : > { %v227_v2 = vmul.f32 0.1, %v211_v0  ;;  %v259_v3 = vld [vmem:[%s782_s14] sm:$0xff]  ;;  %v228_v4 = vmul.f32 0.1, %v212_v1  ;;  %v213_v5 = vld [vmem:[%s790_s26 + $0x10] sm:$0xff]  ;;  %s320_s16 = scalar_lea.hbm %s885_s2, %s446_s20 }
  0x3c   : > { %v260_v6 = vld [vmem:[%s782_s14 + $0x8] sm:$0xff]  ;;  %v229_v7 = vmul.f32 0.1, %v213_v5  ;;  %v261_v8 = vld [vmem:[%s782_s14 + $0x10] sm:$0xff]  ;;  %v214_v9 = vld [vmem:[%s790_s26 + $0x18] sm:$0xff]  ;;  %s321_s17 = sshll.u32 %s814_s27, 4  ;;  %s322_s17 = int_to_ptr.vmem [resolvable:$true] %s321_s17 }
  0x3d   : > { %v243_v10 = vadd.f32 1.0, %v227_v2  ;;  %v244_v11 = vadd.f32 1.0, %v228_v4  ;;  %v230_v12 = vmul.f32 0.1, %v214_v9  ;;  %v262_v13 = vld [vmem:[%s782_s14 + $0x18] sm:$0xff]  ;;  %v215_v14 = vld [vmem:[%s790_s26 + $0x20] sm:$0xff] }
  0x3e   : > { %v245_v15 = vadd.f32 1.0, %v229_v7  ;;  %v231_v16 = vmul.f32 0.1, %v215_v14  ;;  %v263_v17 = vld [vmem:[%s782_s14 + $0x20] sm:$0xff]  ;;  %v216_v18 = vld [vmem:[%s790_s26 + $0x28] sm:$0xff]  ;;  %v217_v19 = vld [vmem:[%s790_s26 + $0x30] sm:$0xff] }
  0x3f   : > { %v275_v20 = vmul.f32 %v259_v3, %v243_v10  ;;  %v276_v21 = vmul.f32 %v260_v6, %v244_v11  ;;  %v246_v22 = vadd.f32 1.0, %v230_v12  ;;  %v232_v23 = vmul.f32 0.1, %v216_v18  ;;  %v264_v24 = vld [vmem:[%s782_s14 + $0x28] sm:$0xff]  ;;  %v265_v25 = vld [vmem:[%s782_s14 + $0x30] sm:$0xff]  ;;  %v218_v26 = vld [vmem:[%s790_s26 + $0x38] sm:$0xff] }
  0x40   : > { %v277_v27 = vmul.f32 %v261_v8, %v245_v15  ;;  %v247_v28 = vadd.f32 1.0, %v231_v16  ;;  %v233_v29 = vmul.f32 0.1, %v217_v19  ;;  %v234_v30 = vmul.f32 0.1, %v218_v26  ;;  %v219_v31 = vld [vmem:[%s790_s26 + $0x40] sm:$0xff] }
  0x41   : > { %291 = vst [vmem:[%s814_s27] sm:$0xff] %v275_v20  ;;  %v278_v32 = vmul.f32 %v262_v13, %v246_v22  ;;  %v248_v33 = vadd.f32 1.0, %v232_v23  ;;  %v266_v34 = vld [vmem:[%s782_s14 + $0x38] sm:$0xff]  ;;  %v235_v35 = vmul.f32 0.1, %v219_v31  ;;  %v267_v36 = vld [vmem:[%s782_s14 + $0x40] sm:$0xff]  ;;  %v220_v37 = vld [vmem:[%s790_s26 + $0x48] sm:$0xff] }
  0x42   : > { %292 = vst [vmem:[%s814_s27 + $0x8] sm:$0xff] %v276_v21  ;;  %v279_v38 = vmul.f32 %v263_v17, %v247_v28  ;;  %v249_v39 = vadd.f32 1.0, %v233_v29  ;;  %v250_v40 = vadd.f32 1.0, %v234_v30  ;;  %v236_v41 = vmul.f32 0.1, %v220_v37  ;;  %v221_v42 = vld [vmem:[%s790_s26 + $0x50] sm:$0xff] }
  0x43   : > { %293 = vst [vmem:[%s814_s27 + $0x10] sm:$0xff] %v277_v27  ;;  %v280_v43 = vmul.f32 %v264_v24, %v248_v33  ;;  %v251_v44 = vadd.f32 1.0, %v235_v35  ;;  %v268_v45 = vld [vmem:[%s782_s14 + $0x48] sm:$0xff]  ;;  %v237_v46 = vmul.f32 0.1, %v221_v42  ;;  %v222_v47 = vld [vmem:[%s790_s26 + $0x58] sm:$0xff] }
  0x44   : > { %294 = vst [vmem:[%s814_s27 + $0x18] sm:$0xff] %v278_v32  ;;  %v281_v48 = vmul.f32 %v265_v25, %v249_v39  ;;  %v282_v49 = vmul.f32 %v266_v34, %v250_v40  ;;  %v252_v50 = vadd.f32 1.0, %v236_v41  ;;  %v269_v51 = vld [vmem:[%s782_s14 + $0x50] sm:$0xff]  ;;  %v238_v52 = vmul.f32 0.1, %v222_v47  ;;  %v223_v53 = vld [vmem:[%s790_s26 + $0x60] sm:$0xff] }
  0x45   : > { %295 = vst [vmem:[%s814_s27 + $0x20] sm:$0xff] %v279_v38  ;;  %v283_v54 = vmul.f32 %v267_v36, %v251_v44  ;;  %v253_v55 = vadd.f32 1.0, %v237_v46  ;;  %v270_v56 = vld [vmem:[%s782_s14 + $0x58] sm:$0xff]  ;;  %v239_v57 = vmul.f32 0.1, %v223_v53  ;;  %v224_v58 = vld [vmem:[%s790_s26 + $0x68] sm:$0xff] }
  0x46   : > { %296 = vst [vmem:[%s814_s27 + $0x28] sm:$0xff] %v280_v43  ;;  %v284_v59 = vmul.f32 %v268_v45, %v252_v50  ;;  %v254_v60 = vadd.f32 1.0, %v238_v52  ;;  %v271_v61 = vld [vmem:[%s782_s14 + $0x60] sm:$0xff]  ;;  %v240_v62 = vmul.f32 0.1, %v224_v58  ;;  %v225_v63 = vld [vmem:[%s790_s26 + $0x70] sm:$0xff] }
  0x47   : > { %297 = vst [vmem:[%s814_s27 + $0x30] sm:$0xff] %v281_v48  ;;  %v285_v0 = vmul.f32 %v269_v51, %v253_v55  ;;  %v255_v1 = vadd.f32 1.0, %v239_v57  ;;  %v272_v2 = vld [vmem:[%s782_s14 + $0x68] sm:$0xff]  ;;  %v241_v3 = vmul.f32 0.1, %v225_v63  ;;  %v226_v4 = vld [vmem:[%s790_s26 + $0x78] sm:$0xff] }
  0x48   : > { %298 = vst [vmem:[%s814_s27 + $0x38] sm:$0xff] %v282_v49  ;;  %v286_v5 = vmul.f32 %v270_v56, %v254_v60  ;;  %v256_v6 = vadd.f32 1.0, %v240_v62  ;;  %v273_v7 = vld [vmem:[%s782_s14 + $0x70] sm:$0xff]  ;;  %v242_v8 = vmul.f32 0.1, %v226_v4  ;;  %v274_v11 = vld [vmem:[%s782_s14 + $0x78] sm:$0xff] }
  0x49   : > { %299 = vst [vmem:[%s814_s27 + $0x40] sm:$0xff] %v283_v54  ;;  %v287_v9 = vmul.f32 %v271_v61, %v255_v1  ;;  %v257_v10 = vadd.f32 1.0, %v241_v3  ;;  %s323_s13 = sshll.u32 %s320_s16, 4  ;;  %s308_s19 = scalar_lea.sflag [#allocation4], %s775_s23  ;;  %s324_s13 = int_to_ptr.hbm [resolvable:$true] %s323_s13 }
  0x4a   : > { %300 = vst [vmem:[%s814_s27 + $0x48] sm:$0xff] %v284_v59  ;;  %v288_v12 = vmul.f32 %v272_v2, %v256_v6  ;;  %v258_v13 = vadd.f32 1.0, %v242_v8  ;;  %s576_s29 = sshra.s32 %s324_s13, 4  ;;  %s582_s24 = scalar_lea.hbm %s885_s2, 256  ;;  %s577_s29 = int_to_ptr.hbm [resolvable:$true] %s576_s29 }
  0x4b   : > { %301 = vst [vmem:[%s814_s27 + $0x50] sm:$0xff] %v285_v0  ;;  %v289_v14 = vmul.f32 %v273_v7, %v257_v10  ;;  %s578_s3 = scalar_lea.hbm %s577_s29, 128  ;;  %p583_p10 = scmp.lt.s32.totalorder %s577_s29, %s885_s2 }
  0x4c   : > { %302 = vst [vmem:[%s814_s27 + $0x58] sm:$0xff] %v286_v5  ;;  %v290_v15 = vmul.f32 %v274_v11, %v258_v13  ;;  %p579_p6 = scmp.ne.s32.totalorder %s577_s29, %s578_s3  ;;  %p584_p2 = scmp.lt.s32.totalorder %s582_s24, %s578_s3 }
  0x4d   : > { %303 = vst [vmem:[%s814_s27 + $0x60] sm:$0xff] %v287_v9 }
  0x4e   : > { %304 = vst [vmem:[%s814_s27 + $0x68] sm:$0xff] %v288_v12  ;;  %p580_p13 = pnand %p579_p6, %p703_p11  ;;  %p585_p9 = por %p584_p2, %p583_p10 }
  0x4f   : > { %305 = vst [vmem:[%s814_s27 + $0x70] sm:$0xff] %v289_v14 }
  0x50   : > { %306 = vst [vmem:[%s814_s27 + $0x78] sm:$0xff] %v290_v15  ;;  %p581_p3 = pneg %p580_p13 }
  0x52   : > { %p586_p0 = pnand %p585_p9, %p581_p3 }
  0x54   : > { %589 = shalt.err (!%p586_p0)
}
  0x55   : > { %s636_s23 = smov 256   ;;  %s637_s7 = smov 16  }
  0x56   : > { %451 = dma.vmem_to_hbm [thread:$0]  (%p703_p11), %s322_s17, 2048, %s324_s13, %s308_s19, %s636_s23, %s636_s23, %s637_s7  }
  0x57 PF: > { %s338_s14 = sand.u32 1, %s620_s9   ;;  %p892_p1 = scmp.ge.s32.totalorder %s632_s12, 2 }
  0x58   : > { %s339_s4 = scalar_lea.sflag [#allocation4], %s338_s14 }
  0x59   : > { %p461_p4 = pnand %p892_p1, %p707_p12 }
  0x5b   : > { %p462_p7 = pneg %p461_p4 }
  0x5d   : > { %615 = dma.done.wait (%p462_p7), %s339_s4, 2048  }
  0x5e   : > { %617 = vsyncadd (%p462_p7), %s339_s4, 4294965248  ;;  %p18_p5 = scmp.ge.s32.totalorder %s678_s15, 4   ;;  %s893_s9 = smov %s624_s10 }
  0x5f   : > { %s894_s10 = smov %s628_s11  ;;  %s895_s11 = smov %s690_s18 }
  0x60   : > { %s896_s12 = smov %s678_s15  ;;  %20 = sbr.rel (!%p18_p5) target bundleno = 7 (0x7), region = 86 }
  0x65   :  { %345 = vsyncpa [#allocation3], 1 }
  0x66   :  { %347 = vsyncpa [#allocation3 + $0x1], 1 }
  0x67   :  { %348 = vsyncpa [#allocation6], 1 }
  0x68   :  { %350 = vsyncpa [#allocation6 + $0x1], 1 }
  0x69   :  { %351 = vsyncpa [#allocation4], 1 }
  0x6a   :  { %353 = vsyncpa [#allocation4 + $0x1], 1 }

</bundles_post_ra>
